<compile_context>
chip_gen: v5e
topology: v5e:2x2
jax: 0.10.0
libtpu: 0.0.40
codegen_flags: <defaults>
</compile_context>

<pallas_src>
import jax
import jax.numpy as jnp
from jax.experimental import pallas as pl
from jax.experimental.pallas import tpu as pltpu


def _round_up(n, m):
    return ((n + m - 1) // m) * m


def _pad_axis(a, axis, target):
    pad = target - a.shape[axis]
    if pad <= 0:
        return a
    widths = [(0, 0)] * a.ndim
    widths[axis] = (0, pad)
    return jnp.pad(a, widths)


def _vmem_cap_bytes():
    """~85% of physical VMEM: headroom for compiler internal scratch."""
    try:
        phys = int(pltpu.get_tpu_info().vmem_capacity_bytes)
    except Exception:
        phys = 64 << 20  # conservative fallback (v7x physical size)
    return int(phys * 0.85)


def _const_spec(shape):
    """Resident (grid-invariant) operand: single-buffered when supported."""
    try:
        return pl.BlockSpec(shape, lambda i: (0, 0), pipeline_mode=pl.Buffered(1))
    except TypeError:  # older BlockSpec signature without pipeline_mode
        return pl.BlockSpec(shape, lambda i: (0, 0))


def ttt_kernel(x_ref, wf_ref, bf_ref, wab_ref, bab_ref, ya_ref, yb_ref):
    """h = x @ Wf + bf ;  y = h @ [Wa|Wb] + [ba|bb] ; split at a 128-aligned lane."""
    h = jnp.dot(x_ref[...], wf_ref[...], preferred_element_type=jnp.float32)
    h = h + bf_ref[...]                       # f32 bias epilogue on the VPU
    h = h.astype(wab_ref.dtype)               # MXU-native dtype for the head matmul
    y = jnp.dot(h, wab_ref[...], preferred_element_type=jnp.float32) + bab_ref[...]
    oa = ya_ref.shape[-1]                     # 128-multiple -> tile-aligned VMEM split
    ya_ref[...] = y[:, :oa].astype(ya_ref.dtype)
    yb_ref[...] = y[:, oa:].astype(yb_ref.dtype)


def prepare_ttt_params(wf, bf, wa, ba, wb, bb, *, compute_dtype=jnp.bfloat16):
    """One-time weight prep (hoisted out of the hot path): pad feature dims to
    multiples of 128, fuse the A|B heads, cast to the MXU compute dtype.

    wf: [IN, HID]  bf: [1, HID]   wa: [HID, OUT_A]  ba: [1, OUT_A]
    wb: [HID, OUT_B]  bb: [1, OUT_B]
    """
    compute_dtype = jnp.dtype(compute_dtype)
    IN, HID = wf.shape
    OUT_A = wa.shape[1]
    OUT_B = wb.shape[1]

    IN_p = _round_up(IN, 128)
    HID_p = _round_up(HID, 128)
    OUT_A_p = _round_up(OUT_A, 128)
    OUT_B_p = _round_up(OUT_B, 128)

    wfp = _pad_axis(_pad_axis(wf, 0, IN_p), 1, HID_p).astype(compute_dtype)
    bfp = _pad_axis(jnp.reshape(bf, (1, -1)), 1, HID_p).astype(jnp.float32)

    wab = jnp.concatenate([_pad_axis(wa, 1, OUT_A_p), _pad_axis(wb, 1, OUT_B_p)], axis=1)
    wabp = _pad_axis(wab, 0, HID_p).astype(compute_dtype)
    babp = jnp.concatenate([_pad_axis(jnp.reshape(ba, (1, -1)), 1, OUT_A_p),
                            _pad_axis(jnp.reshape(bb, (1, -1)), 1, OUT_B_p)],
                           axis=1).astype(jnp.float32)

    return dict(wfp=wfp, bfp=bfp, wabp=wabp, babp=babp,
                dims=(IN, IN_p, HID_p, OUT_A, OUT_A_p, OUT_B, OUT_B_p),
                compute_dtype=compute_dtype)


def ttt_system_prepared(x, params, *, tm=None, out_dtype=None):
    """Hot path: fused F -> (A, B) forward pass on pre-padded params.

    x: [M, IN]  ->  (ya [M, OUT_A], yb [M, OUT_B])
    """
    wfp, bfp, wabp, babp = params["wfp"], params["bfp"], params["wabp"], params["babp"]
    IN, IN_p, HID_p, OUT_A, OUT_A_p, OUT_B, OUT_B_p = params["dims"]
    compute_dtype = params["compute_dtype"]
    out_dtype = jnp.dtype(out_dtype) if out_dtype is not None else x.dtype

    M = x.shape[0]
    OUT_p = OUT_A_p + OUT_B_p
    wbytes = compute_dtype.itemsize
    obytes = jnp.dtype(out_dtype).itemsize

    vmem_cap = _vmem_cap_bytes()
    sub = 32 // wbytes                                  # sublane multiple (8 f32, 16 bf16)
    tm_cap = 512 if vmem_cap >= (80 << 20) else 256     # v5e/v6e vs v7x

    def vmem_need(tm_):
        return (2 * tm_ * IN_p * wbytes                 # streamed x tiles (double buffered)
                + 2 * tm_ * OUT_p * obytes              # streamed y tiles (double buffered)
                + (IN_p * HID_p + HID_p * OUT_p) * wbytes   # resident weights (single buffer)
                + (HID_p + OUT_p) * 4                   # resident biases (f32)
                + tm_ * HID_p * 4 + tm_ * OUT_p * 4     # f32 h / y staging
                + (4 << 20))                            # headroom

    if tm is None:
        tm = min(_round_up(M, sub), tm_cap)
        # Keep >= 2 grid steps when the batch allows it so both v7x TensorCores
        # get work via the "parallel" axis (near-free on 1-TC chips).
        if M > sub and _round_up(M, tm) // tm < 2:
            tm = max(sub, _round_up(pl.cdiv(_round_up(M, sub), 2), sub))
        while tm > sub and vmem_need(tm) > vmem_cap:
            tm = max(sub, _round_up(tm // 2, sub))
    tm = _round_up(tm, sub)
    M_p = _round_up(M, tm)
    grid = (M_p // tm,)

    # Minimal x copy: rows padded only to the chosen tile, lanes only if IN%128.
    # TODO(synk): add a K/N-tiled accumulator path for models whose weights
    # exceed the resident-VMEM budget (hits first on v7x's 64 MiB).
    xp = _pad_axis(_pad_axis(x, 1, IN_p), 0, M_p).astype(compute_dtype)

    flops = 2 * M_p * (IN_p * HID_p + HID_p * OUT_p)
    bytes_accessed = (M_p * IN_p * wbytes
                      + (IN_p * HID_p + HID_p * OUT_p) * wbytes
                      + (HID_p + OUT_p) * 4
                      + M_p * OUT_p * obytes)

    ya_p, yb_p = pl.pallas_call(
        ttt_kernel,
        out_shape=(jax.ShapeDtypeStruct((M_p, OUT_A_p), out_dtype),
                   jax.ShapeDtypeStruct((M_p, OUT_B_p), out_dtype)),
        grid_spec=pltpu.PrefetchScalarGridSpec(
            num_scalar_prefetch=0,
            grid=grid,
            in_specs=[
                pl.BlockSpec((tm, IN_p), lambda i: (i, 0)),          # streamed x rows
                _const_spec((IN_p, HID_p)), _const_spec((1, HID_p)),  # F weights (resident)
                _const_spec((HID_p, OUT_p)), _const_spec((1, OUT_p)),  # fused A|B (resident)
            ],
            out_specs=[pl.BlockSpec((tm, OUT_A_p), lambda i: (i, 0)),
                       pl.BlockSpec((tm, OUT_B_p), lambda i: (i, 0))],
        ),
        compiler_params=pltpu.CompilerParams(
            dimension_semantics=("parallel",),
            vmem_limit_bytes=int(min(max(vmem_need(tm), 16 << 20), vmem_cap))),
        cost_estimate=pl.CostEstimate(
            flops=int(flops), transcendentals=0, bytes_accessed=int(bytes_accessed)),
    )(xp, wfp, bfp, wabp, babp)

    ya = ya_p[:M, :OUT_A] if (M_p, OUT_A_p) != (M, OUT_A) else ya_p
    yb = yb_p[:M, :OUT_B] if (M_p, OUT_B_p) != (M, OUT_B) else yb_p
    return ya, yb


def ttt_system(x, wf, bf, wa, ba, wb, bb, *, compute_dtype=jnp.bfloat16,
               tm=None, out_dtype=None):
    """Convenience wrapper (one-off use). For repeated calls, hoist
    prepare_ttt_params() out of the call path."""
    params = prepare_ttt_params(wf, bf, wa, ba, wb, bb, compute_dtype=compute_dtype)
    return ttt_system_prepared(x, params, tm=tm, out_dtype=out_dtype)


def _linear_init(key, fan_in, fan_out, dtype=jnp.float32):
    """PyTorch-Linear-style init: U(-1/sqrt(fan_in), 1/sqrt(fan_in)); W is [in, out]."""
    kw, kb = jax.random.split(key)
    bound = 1.0 / (fan_in ** 0.5)
    w = jax.random.uniform(kw, (fan_in, fan_out), dtype, -bound, bound)
    b = jax.random.uniform(kb, (1, fan_out), dtype, -bound, bound)
    return w, b


def _reference(x, wf, bf, wa, ba, wb, bb):
    h = x @ wf + bf
    return h @ wa + ba, h @ wb + bb


if __name__ == "__main__":
    # Small shapes consistent with the module: x is [batch, in_features].
    BATCH, IN, HID, OUT_A, OUT_B = 16, 32, 64, 32, 16

    root = jax.random.PRNGKey(0)
    kx, kf, ka, kb = jax.random.split(root, 4)

    x = jax.random.normal(kx, (BATCH, IN), jnp.float32)
    wf, bf = _linear_init(kf, IN, HID)
    wa, ba = _linear_init(ka, HID, OUT_A)
    wb, bb = _linear_init(kb, HID, OUT_B)

    ya_ref, yb_ref = _reference(x, wf, bf, wa, ba, wb, bb)

    # f32 compute path: must match the reference tightly.
    params_f32 = prepare_ttt_params(wf, bf, wa, ba, wb, bb, compute_dtype=jnp.float32)
    ya, yb = ttt_system_prepared(x, params_f32)
    jax.block_until_ready((ya, yb))
    assert ya.shape == (BATCH, OUT_A) and yb.shape == (BATCH, OUT_B)
    assert jnp.allclose(ya, ya_ref, atol=1e-5, rtol=1e-5)
    assert jnp.allclose(yb, yb_ref, atol=1e-5, rtol=1e-5)

    # Default bf16 compute path (f32 accumulation): check relative error norm.
    params_bf16 = prepare_ttt_params(wf, bf, wa, ba, wb, bb)  # compute_dtype=bf16
    ya16, yb16 = ttt_system_prepared(x, params_bf16)
    jax.block_until_ready((ya16, yb16))
    assert ya16.shape == (BATCH, OUT_A) and yb16.shape == (BATCH, OUT_B)
    rel_a = (jnp.linalg.norm(ya16.astype(jnp.float32) - ya_ref)
             / (jnp.linalg.norm(ya_ref) + 1e-30))
    rel_b = (jnp.linalg.norm(yb16.astype(jnp.float32) - yb_ref)
             / (jnp.linalg.norm(yb_ref) + 1e-30))
    assert rel_a < 5e-2 and rel_b < 5e-2, (rel_a, rel_b)

    print("KERNEL_OK")
</pallas_src>

<mosaic_0001>
module attributes {stable_mosaic.version = 11 : i64} {
  func.func @ttt_kernel(%arg0: i32, %arg1: memref<8x128xf32, #tpu.memory_space<vmem>>, %arg2: memref<128x128xf32, #tpu.memory_space<vmem>>, %arg3: memref<1x128xf32, #tpu.memory_space<vmem>>, %arg4: memref<128x256xf32, #tpu.memory_space<vmem>>, %arg5: memref<1x256xf32, #tpu.memory_space<vmem>>, %arg6: memref<8x128xf32, #tpu.memory_space<vmem>>, %arg7: memref<8x128xf32, #tpu.memory_space<vmem>>) attributes {dimension_semantics = [#tpu.dimension_semantics<parallel>], iteration_bounds = array<i64: 2>, scalar_prefetch = 0 : i64, scratch_operands = 0 : i64, tpu.core_type = #tpu.core_type<tc>, window_params = [{transform_indices = @transform_0, window_bounds = array<i64: 8, 128>}, {pipeline_mode = #tpu.pipeline_mode<synchronous>, transform_indices = @transform_1, window_bounds = array<i64: 128, 128>}, {pipeline_mode = #tpu.pipeline_mode<synchronous>, transform_indices = @transform_2, window_bounds = array<i64: 1, 128>}, {pipeline_mode = #tpu.pipeline_mode<synchronous>, transform_indices = @transform_3, window_bounds = array<i64: 128, 256>}, {pipeline_mode = #tpu.pipeline_mode<synchronous>, transform_indices = @transform_4, window_bounds = array<i64: 1, 256>}, {transform_indices = @transform_5, window_bounds = array<i64: 8, 128>}, {transform_indices = @transform_6, window_bounds = array<i64: 8, 128>}]} {
    %c0 = arith.constant 0 : index
    %c0_0 = arith.constant 0 : index
    %0 = vector.load %arg1[%c0, %c0_0] : memref<8x128xf32, #tpu.memory_space<vmem>>, vector<8x128xf32>
    %c0_1 = arith.constant 0 : index
    %c0_2 = arith.constant 0 : index
    %1 = vector.load %arg2[%c0_1, %c0_2] : memref<128x128xf32, #tpu.memory_space<vmem>>, vector<128x128xf32>
    %cst = arith.constant dense<0.000000e+00> : vector<8x128xf32>
    %2 = tpu.matmul %0, %1, %cst {dimension_numbers = #tpu.dot_dimension_numbers<[1], [0], [0], [1], [0, 0, 1, 1], [], []>} : vector<8x128xf32>, vector<128x128xf32>, vector<8x128xf32> -> vector<8x128xf32>
    %c0_3 = arith.constant 0 : index
    %c0_4 = arith.constant 0 : index
    %3 = vector.load %arg3[%c0_3, %c0_4] : memref<1x128xf32, #tpu.memory_space<vmem>>, vector<1x128xf32>
    %4 = vector.broadcast %3 : vector<1x128xf32> to vector<8x128xf32>
    %5 = arith.addf %2, %4 : vector<8x128xf32>
    %c0_5 = arith.constant 0 : index
    %c0_6 = arith.constant 0 : index
    %6 = vector.load %arg4[%c0_5, %c0_6] : memref<128x256xf32, #tpu.memory_space<vmem>>, vector<128x256xf32>
    %cst_7 = arith.constant dense<0.000000e+00> : vector<8x256xf32>
    %7 = tpu.matmul %5, %6, %cst_7 {dimension_numbers = #tpu.dot_dimension_numbers<[1], [0], [0], [1], [0, 0, 1, 1], [], []>} : vector<8x128xf32>, vector<128x256xf32>, vector<8x256xf32> -> vector<8x256xf32>
    %c0_8 = arith.constant 0 : index
    %c0_9 = arith.constant 0 : index
    %8 = vector.load %arg5[%c0_8, %c0_9] : memref<1x256xf32, #tpu.memory_space<vmem>>, vector<1x256xf32>
    %9 = vector.broadcast %8 : vector<1x256xf32> to vector<8x256xf32>
    %10 = arith.addf %7, %9 : vector<8x256xf32>
    %11 = vector.extract_strided_slice %10 {offsets = [0, 0], sizes = [8, 128], strides = [1, 1]} : vector<8x256xf32> to vector<8x128xf32>
    %c0_10 = arith.constant 0 : index
    %c0_11 = arith.constant 0 : index
    %12 = vector.load %arg6[%c0_10, %c0_11] : memref<8x128xf32, #tpu.memory_space<vmem>>, vector<8x128xf32>
    tpu.vector_store %arg6[%c0_10, %c0_11], %11 {strides = array<i32>} : memref<8x128xf32, #tpu.memory_space<vmem>>, vector<8x128xf32>,
    %13 = vector.extract_strided_slice %10 {offsets = [0, 128], sizes = [8, 128], strides = [1, 1]} : vector<8x256xf32> to vector<8x128xf32>
    %c0_12 = arith.constant 0 : index
    %c0_13 = arith.constant 0 : index
    %14 = vector.load %arg7[%c0_12, %c0_13] : memref<8x128xf32, #tpu.memory_space<vmem>>, vector<8x128xf32>
    tpu.vector_store %arg7[%c0_12, %c0_13], %13 {strides = array<i32>} : memref<8x128xf32, #tpu.memory_space<vmem>>, vector<8x128xf32>,
    return
  }
  func.func @transform_0(%arg0: i32) -> (i32, i32) {
    %c0_i32 = arith.constant 0 : i32
    %c0_i32_0 = arith.constant 0 : i32
    return %arg0, %c0_i32 : i32, i32
  }
  func.func @transform_1(%arg0: i32) -> (i32, i32) {
    %c0_i32 = arith.constant 0 : i32
    %c0_i32_0 = arith.constant 0 : i32
    %c0_i32_1 = arith.constant 0 : i32
    return %c0_i32, %c0_i32_0 : i32, i32
  }
  func.func @transform_2(%arg0: i32) -> (i32, i32) {
    %c0_i32 = arith.constant 0 : i32
    %c0_i32_0 = arith.constant 0 : i32
    %c0_i32_1 = arith.constant 0 : i32
    return %c0_i32, %c0_i32_0 : i32, i32
  }
  func.func @transform_3(%arg0: i32) -> (i32, i32) {
    %c0_i32 = arith.constant 0 : i32
    %c0_i32_0 = arith.constant 0 : i32
    %c0_i32_1 = arith.constant 0 : i32
    return %c0_i32, %c0_i32_0 : i32, i32
  }
  func.func @transform_4(%arg0: i32) -> (i32, i32) {
    %c0_i32 = arith.constant 0 : i32
    %c0_i32_0 = arith.constant 0 : i32
    %c0_i32_1 = arith.constant 0 : i32
    return %c0_i32, %c0_i32_0 : i32, i32
  }
  func.func @transform_5(%arg0: i32) -> (i32, i32) {
    %c0_i32 = arith.constant 0 : i32
    %c0_i32_0 = arith.constant 0 : i32
    return %arg0, %c0_i32 : i32, i32
  }
  func.func @transform_6(%arg0: i32) -> (i32, i32) {
    %c0_i32 = arith.constant 0 : i32
    %c0_i32_0 = arith.constant 0 : i32
    return %arg0, %c0_i32 : i32, i32
  }
}

</mosaic_0001>

<bundles_post_ra>
// kernel: tpu_custom_call.1
= control target key start
LH: loop header
LB: loop body
LE: loop exit
PB: predicated region body
PF: predicated region fallthrough
CT: control target
= control target key end

     0   :  { %s1097_s0 = inlined_call_operand.hbm [shape: f32[16,128], index: 0, kind: input, shape index: {}]   ;;  %s1098_s1 = inlined_call_operand.hbm [shape: f32[128,128], index: 1, kind: input, shape index: {}]   ;;  %s1099_s2 = inlined_call_operand.vmem [shape: f32[1,128], index: 2, kind: input, shape index: {}]   ;;  %s1100_s3 = inlined_call_operand.hbm [shape: f32[128,256], index: 3, kind: input, shape index: {}]   ;;  %s1101_s4 = inlined_call_operand.vmem [shape: f32[1,256], index: 4, kind: input, shape index: {}]   ;;  %s1102_s5 = inlined_call_operand.hbm [shape: f32[16,128], index: 5, kind: output, shape index: {0}]   ;;  %s1103_s6 = inlined_call_operand.hbm [shape: f32[16,128], index: 6, kind: output, shape index: {1}]  }
   0x1   :  { %1104 = sst [smem:[#allocation15_spill]] %s1098_s1 }
   0x2   :  { %12 = vsyncpa [#allocation3], 0 }
   0x3   :  { %14 = vsyncpa [#allocation3 + $0x1], 0 }
   0x4   :  { %15 = vsyncpa [#allocation6], 0 }
   0x5   :  { %16 = vsyncpa [#allocation4], 0 }
   0x6   :  { %18 = vsyncpa [#allocation4 + $0x1], 0 }
   0x7   :  { %19 = vsyncpa [#allocation10], 0 }
   0x8   :  { %21 = vsyncpa [#allocation10 + $0x1], 0  ;;  %s922_s21 = smov 0   ;;  %s924_s22 = smov 0  }
   0x9   :  { %s926_s23 = smov 0   ;;  %s928_s24 = smov 0  }
   0xa LB: > { %s1105_s1 = sld [smem:[#allocation15_spill]]  ;;  %s946_s28 = sadd.s32 4294967295, %s879_s24   ;;  %s879_s24 = sphi %s928_s24, %s1116_s24   ;;  %s875_s23 = sphi %s926_s23, %s1115_s23   ;;  %s871_s22 = sphi %s924_s22, %s1114_s22   ;;  %s867_s21 = sphi %s922_s21, %s1113_s21  }
   0xb   : > { %p592_p0 = scmp.ge.s32.totalorder %s879_s24, 1  ;;  %p48_p1 = scmp.eq.s32.totalorder %s946_s28, 0 }
   0xc   : > { %p194_p2 = scmp.lt.s32.totalorder %s879_s24, 3  ;;  %s881_s30 = smov [#allocation5]  }
   0xd   : > { %s207_s7 = sshll.u32 %s881_s30, 4  ;;  %s222_s10 = sshll.u32 %s1100_s3, 4  ;;  %s208_s7 = int_to_ptr.vmem [resolvable:$true] %s207_s7  ;;  %s223_s10 = int_to_ptr.hbm [resolvable:$true] %s222_s10 }
   0xe   : > { %p951_p3 = pnand %p592_p0, %p194_p2  ;;  %s882_s11 = smov [#allocation7]  }
   0xf   : > { %s224_s12 = sshll.u32 %s882_s11, 4  ;;  %s883_s13 = smov 128   ;;  %s225_s12 = int_to_ptr.vmem [resolvable:$true] %s224_s12 }
  0x10   : > { %s205_s27 = sshll.u32 %s1105_s1, 4  ;;  %p624_p4 = pneg %p951_p3  ;;  %s206_s27 = int_to_ptr.hbm [resolvable:$true] %s205_s27 }
  0x11   : > { %s884_s14 = smov 8   ;;  %s885_s15 = smov 256  }
  0x12   : > { %p625_p6 = pnand %p624_p4, %p48_p1  ;;  %s886_s16 = smov 16  }
  0x13   : > { %s591_s17 = sadd.s32 4294967294, %s879_s24   ;;  %s965_s18 = sadd.s32 1, %s879_s24  }
  0x14   : > { %627 = dma.hbm_to_vmem [thread:$0]  (!%p625_p6), %s206_s27, 2048, %s208_s7, [#allocation6], %s883_s13, %s883_s13, %s884_s14  }
  0x15   : > { %630 = dma.hbm_to_vmem [thread:$0]  (!%p625_p6), %s223_s10, 4096, %s225_s12, [#allocation6], %s885_s15, %s885_s15, %s886_s16  }
  0x16   : > { %s31_s19 = ssub.s32 %s879_s24, %s965_s18  ;;  %s34_s20 = sadd.s32 1, %s875_s23 }
  0x17   : > { %p32_p7 = scmp.eq.s32.totalorder %s31_s19, 0  ;;  %p41_p8 = scmp.ne.s32.totalorder %s875_s23, %s871_s22 }
  0x18   : > { %p42_p9 = scmp.eq.s32.totalorder %s879_s24, 0  ;;  %p47_p10 = scmp.ne.s32.totalorder %s871_s22, %s867_s21 }
  0x19   : > { %s976_s25 = scalar_select %p32_p7, %s875_s23, %s34_s20  }
  0x1a   : > { %p978_p11 = por %p42_p9, %p41_p8  ;;  %p984_p12 = por %p48_p1, %p47_p10 }
  0x1b   : > { %p155_p13 = scmp.eq.s32.totalorder %s946_s28, 1  ;;  %p161_p0 = scmp.eq.s32.totalorder %s591_s17, 1 }
  0x1c   : > { %p644_p2 = scmp.lt.s32.totalorder %s879_s24, 2  ;;  %s241_s30 = sand.u32 1, %s875_s23  }
  0x1d   : > { %p991_p4 = por %p155_p13, %p41_p8  ;;  %p995_p6 = por %p161_p0, %p47_p10 }
  0x1e   : > { %s596_s9 = sshll.u32 %s241_s30, 3  ;;  %s597_s10 = sshll.u32 %s879_s24, 3 }
  0x1f   : > { %s249_s13 = scalar_lea.hbm %s1097_s0, %s597_s10  ;;  %s245_s14 = scalar_lea.vmem [#allocation2], %s596_s9 }
  0x20   : > { %s253_s15 = sshll.u32 %s245_s14, 4  ;;  %s251_s16 = sshll.u32 %s249_s13, 4  ;;  %s254_s15 = int_to_ptr.vmem [resolvable:$true] %s253_s15  ;;  %s252_s16 = int_to_ptr.hbm [resolvable:$true] %s251_s16 }
  0x21   : > { %p1005_p7 = pnand %p644_p2, %p978_p11  ;;  %s242_s19 = scalar_lea.sflag [#allocation3], %s241_s30 }
  0x22   : > { %s747_s20 = sshra.s32 %s252_s16, 4  ;;  %s754_s11 = scalar_lea.hbm %s1097_s0, 16  ;;  %s748_s20 = int_to_ptr.hbm [resolvable:$true] %s747_s20 }
  0x23   : > { %s749_s1 = scalar_lea.hbm %s748_s20, 8  ;;  %p751_p9 = pneg %p1005_p7 }
  0x24   : > { %p750_p8 = scmp.ne.s32.totalorder %s748_s20, %s749_s1  ;;  %p755_p11 = scmp.lt.s32.totalorder %s748_s20, %s1097_s0 }
  0x25   : > { %p756_p0 = scmp.lt.s32.totalorder %s754_s11, %s749_s1 }
  0x26   : > { %p752_p10 = pnand %p751_p9, %p750_p8 }
  0x27   : > { %p757_p2 = por %p756_p0, %p755_p11 }
  0x28   : > { %p753_p13 = pneg %p752_p10 }
  0x2a   : > { %p758_p5 = pnand %p757_p2, %p753_p13 }
  0x2c   : > { %761 = shalt.err (!%p758_p5)
}
  0x2d   : > { %634 = dma.hbm_to_vmem [thread:$0]  (!%p1005_p7), %s252_s16, 128, %s254_s15, %s242_s19  }
  0x2e   : > { %262 = sbr.rel (%p951_p3) target bundleno = 357 (0x165), region = 40  ;;  %s1022_s30 = sand.u32 (!%p951_p3), 1, %s871_s22  }
  0x2f   : > { %s1025_s13 = sshll.u32 (!%p951_p3), %s1022_s30, 3  ;;  %s265_s14 = scalar_lea.sflag (!%p951_p3), [#allocation3], %s1022_s30 }
  0x30   : > { %s268_s1 = scalar_lea.vmem (!%p951_p3), [#allocation2], %s1025_s13 }
  0x33   : > { %850 = dma.done.wait (%p984_p12), %s265_s14, 128  }
  0x34   : > { %852 = vsyncadd (%p984_p12), %s265_s14, 4294967168 }
  0x35   : > { %854 = dma.done.wait (%p48_p1), [#allocation6], 6144  }
  0x36   : > { %856 = vsyncadd (%p48_p1), [#allocation6], 4294961152  ;;  %v329_v0 = vld [vmem:[#allocation5 + $0x78] sm:$0xff]  ;;  %v328_v1 = vld [vmem:[#allocation5 + $0x70] sm:$0xff]  ;;  %s606_s15 = sshll.u32 %s946_s28, 3  ;;  %s305_s10 = scalar_lea.vmem [#allocation8], %s1025_s13 }
  0x37   : > { %334 = vmatpush.msra.mxu0 %v329_v0  ;;  %v327_v2 = vld [vmem:[#allocation5 + $0x68] sm:$0xff]  ;;  %v326_v3 = vld [vmem:[#allocation5 + $0x60] sm:$0xff]  ;;  %v325_v4 = vld [vmem:[#allocation5 + $0x58] sm:$0xff]  ;;  %s450_s9 = scalar_lea.hbm %s1102_s5, %s606_s15  ;;  %s452_s11 = sshll.u32 %s305_s10, 4  ;;  %s453_s11 = int_to_ptr.vmem [resolvable:$true] %s452_s11 }
  0x38   : > { %v384_v5 = vld [vmem:[#allocation7 + $0xf0] sm:$0xff]  ;;  %v385_v6 = vld [vmem:[#allocation7 + $0xf8] sm:$0xff]  ;;  %v382_v7 = vld [vmem:[#allocation7 + $0xe0] sm:$0xff]  ;;  %s454_s12 = sshll.u32 %s450_s9, 4  ;;  %s312_s28 = scalar_lea.vmem [#allocation9], %s1025_s13  ;;  %s455_s12 = int_to_ptr.hbm [resolvable:$true] %s454_s12 }
  0x39   : > { %335 = vmatpush.msra.mxu0 %v328_v1  ;;  %392 = vmatpush.msra.mxu1 %v384_v5  ;;  %v383_v8 = vld [vmem:[#allocation7 + $0xe8] sm:$0xff]  ;;  %v380_v9 = vld [vmem:[#allocation7 + $0xd0] sm:$0xff]  ;;  %v381_v11 = vld [vmem:[#allocation7 + $0xd8] sm:$0xff]  ;;  %s1054_s29 = sshll.u32 %s312_s28, 4  ;;  %s435_s16 = scalar_lea.sflag [#allocation4], %s1022_s30  ;;  %s467_s29 = int_to_ptr.vmem [resolvable:$true] %s1054_s29 }
  0x3a   : > { %412 = vmatpush.msra.mxu2 %v385_v6  ;;  %v324_v10 = vld [vmem:[#allocation5 + $0x50] sm:$0xff]  ;;  %v378_v12 = vld [vmem:[#allocation7 + $0xc0] sm:$0xff]  ;;  %v323_v13 = vld [vmem:[#allocation5 + $0x48] sm:$0xff]  ;;  %s791_s17 = sshra.s32 %s455_s12, 4  ;;  %s792_s17 = int_to_ptr.hbm [resolvable:$true] %s791_s17 }
  0x3b   : > { %336 = vmatpush.msra.mxu0 %v327_v2  ;;  %393 = vmatpush.msra.mxu1 %v382_v7  ;;  %v379_v14 = vld [vmem:[#allocation7 + $0xc8] sm:$0xff]  ;;  %v376_v15 = vld [vmem:[#allocation7 + $0xb0] sm:$0xff]  ;;  %v322_v16 = vld [vmem:[#allocation5 + $0x40] sm:$0xff]  ;;  %s793_s19 = scalar_lea.hbm %s792_s17, 8  ;;  %p798_p12 = scmp.lt.s32.totalorder %s792_s17, %s1102_s5 }
  0x3c   : > { %413 = vmatpush.msra.mxu2 %v383_v8  ;;  %v377_v17 = vld [vmem:[#allocation7 + $0xb8] sm:$0xff]  ;;  %v374_v18 = vld [vmem:[#allocation7 + $0xa0] sm:$0xff]  ;;  %v375_v20 = vld [vmem:[#allocation7 + $0xa8] sm:$0xff]  ;;  %p794_p1 = scmp.ne.s32.totalorder %s792_s17, %s793_s19 }
  0x3d   : > { %337 = vmatpush.msra.mxu0 %v326_v3  ;;  %394 = vmatpush.msra.mxu1 %v380_v9  ;;  %v321_v19 = vld [vmem:[#allocation5 + $0x38] sm:$0xff]  ;;  %v372_v21 = vld [vmem:[#allocation7 + $0x90] sm:$0xff]  ;;  %v370_v24 = vld [vmem:[#allocation7 + $0x80] sm:$0xff] }
  0x3e   : > { %414 = vmatpush.msra.mxu2 %v381_v11  ;;  %v320_v22 = vld [vmem:[#allocation5 + $0x30] sm:$0xff]  ;;  %v373_v23 = vld [vmem:[#allocation7 + $0x98] sm:$0xff]  ;;  %v319_v25 = vld [vmem:[#allocation5 + $0x28] sm:$0xff]  ;;  %p795_p3 = pnand %p794_p1, %p991_p4 }
  0x3f   : > { %338 = vmatpush.msra.mxu0 %v325_v4  ;;  %395 = vmatpush.msra.mxu1 %v378_v12  ;;  %v371_v26 = vld [vmem:[#allocation7 + $0x88] sm:$0xff]  ;;  %v368_v27 = vld [vmem:[#allocation7 + $0x70] sm:$0xff]  ;;  %v318_v28 = vld [vmem:[#allocation5 + $0x20] sm:$0xff] }
  0x40   : > { %415 = vmatpush.msra.mxu2 %v379_v14  ;;  %v369_v29 = vld [vmem:[#allocation7 + $0x78] sm:$0xff]  ;;  %v366_v30 = vld [vmem:[#allocation7 + $0x60] sm:$0xff]  ;;  %v367_v32 = vld [vmem:[#allocation7 + $0x68] sm:$0xff]  ;;  %p796_p5 = pneg %p795_p3 }
  0x41   : > { %339 = vmatpush.msra.mxu0 %v324_v10  ;;  %396 = vmatpush.msra.mxu1 %v376_v15  ;;  %v317_v31 = vld [vmem:[#allocation5 + $0x18] sm:$0xff]  ;;  %v364_v33 = vld [vmem:[#allocation7 + $0x50] sm:$0xff]  ;;  %v362_v36 = vld [vmem:[#allocation7 + $0x40] sm:$0xff] }
  0x42   : > { %416 = vmatpush.msra.mxu2 %v377_v17  ;;  %v316_v34 = vld [vmem:[#allocation5 + $0x10] sm:$0xff]  ;;  %v365_v35 = vld [vmem:[#allocation7 + $0x58] sm:$0xff]  ;;  %v315_v37 = vld [vmem:[#allocation5 + $0x8] sm:$0xff] }
  0x43   : > { %340 = vmatpush.msra.mxu0 %v323_v13  ;;  %397 = vmatpush.msra.mxu1 %v374_v18  ;;  %v363_v38 = vld [vmem:[#allocation7 + $0x48] sm:$0xff]  ;;  %v360_v39 = vld [vmem:[#allocation7 + $0x30] sm:$0xff]  ;;  %v314_v40 = vld [vmem:[#allocation5] sm:$0xff] }
  0x44   : > { %417 = vmatpush.msra.mxu2 %v375_v20  ;;  %v361_v41 = vld [vmem:[#allocation7 + $0x38] sm:$0xff]  ;;  %v358_v43 = vld [vmem:[#allocation7 + $0x20] sm:$0xff]  ;;  %v359_v44 = vld [vmem:[#allocation7 + $0x28] sm:$0xff] }
  0x45   : > { %341 = vmatpush.msra.mxu0 %v322_v16  ;;  %398 = vmatpush.msra.mxu1 %v372_v21  ;;  %v313_v42 = vld [vmem:[%s268_s1] sm:$0xff]  ;;  %v354_v47 = vld [vmem:[#allocation7] sm:$0xff]  ;;  %v355_v48 = vld [vmem:[#allocation7 + $0x8] sm:$0xff]  ;;  %s464_s1 = scalar_lea.hbm %s1103_s6, %s606_s15  ;;  %s797_s15 = scalar_lea.hbm %s1102_s5, 16 }
  0x46   : > { %418 = vmatpush.msra.mxu2 %v373_v23  ;;  %v356_v45 = vld [vmem:[#allocation7 + $0x10] sm:$0xff]  ;;  %v357_v46 = vld [vmem:[#allocation7 + $0x18] sm:$0xff]  ;;  %s468_s27 = sshll.u32 %s464_s1, 4  ;;  %p799_p7 = scmp.lt.s32.totalorder %s797_s15, %s793_s19  ;;  %s469_s27 = int_to_ptr.hbm [resolvable:$true] %s468_s27 }
  0x47   : > { %342 = vmatpush.msra.mxu0 %v321_v19  ;;  %399 = vmatpush.msra.mxu1 %v370_v24  ;;  %v686_v49 = vld [vmem:[%s1099_s2] ss:$0 sm:$0xff] }
  0x48   : > { %419 = vmatpush.msra.mxu2 %v371_v26  ;;  %v386_v52 = vld [vmem:[%s1101_s4] sm:$0x3]  ;;  %p800_p8 = por %p799_p7, %p798_p12 }
  0x49   : > { %343 = vmatpush.msra.mxu0 %v320_v22  ;;  %400 = vmatpush.msra.mxu1 %v368_v27  ;;  %v388_v53 = vperm.slane %v386_v52, 0  ;;  %v389_v56 = vperm.slane %v386_v52, 1 }
  0x4a   : > { %420 = vmatpush.msra.mxu2 %v369_v29  ;;  %p801_p9 = pnand %p800_p8, %p796_p5 }
  0x4b   : > { %344 = vmatpush.msra.mxu0 %v319_v25  ;;  %401 = vmatpush.msra.mxu1 %v366_v30 }
  0x4c   : > { %421 = vmatpush.msra.mxu2 %v367_v32 }
  0x4d   : > { %345 = vmatpush.msra.mxu0 %v318_v28  ;;  %402 = vmatpush.msra.mxu1 %v364_v33 }
  0x4e   : > { %422 = vmatpush.msra.mxu2 %v365_v35 }
  0x4f   : > { %346 = vmatpush.msra.mxu0 %v317_v31  ;;  %403 = vmatpush.msra.mxu1 %v362_v36 }
  0x50   : > { %423 = vmatpush.msra.mxu2 %v363_v38 }
  0x51   : > { %347 = vmatpush.msra.mxu0 %v316_v34  ;;  %404 = vmatpush.msra.mxu1 %v360_v39 }
  0x52   : > { %424 = vmatpush.msra.mxu2 %v361_v41 }
  0x53   : > { %348 = vmatpush.msra.mxu0 %v315_v37  ;;  %405 = vmatpush.msra.mxu1 %v358_v43 }
  0x54   : > { %425 = vmatpush.msra.mxu2 %v359_v44 }
  0x55   : > { %349 = vmatpush.msra.mxu0 %v314_v40  ;;  %406 = vmatpush.msra.mxu1 %v356_v45 }
  0x56   : > { %350 = vmatmul.f32.vlgmr.msra.gmra.mxu0 %v313_v42  ;;  %426 = vmatpush.msra.mxu2 %v357_v46 }
  0x57   : > { %407 = vmatpush.msra.mxu1 %v354_v47 }
  0x58   : > { %427 = vmatpush.msra.mxu2 %v355_v48 }
  0xd3   : > { %v351_v50 = vpop.f32.mrf.mxu0 }
  0xd4   : > { %v352_v51 = vadd.f32 %v686_v49, %v351_v50 }
  0xd6   : > { %408 = vmatmul.f32.vlgmr.msra.gmra.mxu1 %v352_v51  ;;  %428 = vmatmul.f32.vlgmr.msra.gmra.mxu2 %v352_v51 }
 0x153   : > { %v409_v54 = vpop.f32.mrf.mxu1 }
 0x154   : > { %v410_v55 = vadd.f32 %v409_v54, %v388_v53 }
 0x156   : > { %432 = vst [vmem:[%s305_s10] sm:$0xff] %v410_v55 }
 0x157   : > { %804 = shalt.err (!%p801_p9)
}
 0x158   : > { %620 = dma.vmem_to_hbm [thread:$0]  (%p991_p4), %s453_s11, 128, %s455_s12, %s435_s16  }
 0x159   : > { %v429_v57 = vpop.f32.mrf.mxu2  ;;  %s440_s13 = scalar_lea.sflag [#allocation10], %s1022_s30  ;;  %s819_s10 = sshra.s32 %s469_s27, 4  ;;  %s820_s10 = int_to_ptr.hbm [resolvable:$true] %s819_s10 }
 0x15a   : > { %v430_v58 = vadd.f32 %v429_v57, %v389_v56  ;;  %s821_s1 = scalar_lea.hbm %s820_s10, 8  ;;  %s825_s20 = scalar_lea.hbm %s1103_s6, 16 }
 0x15b   : > { %p822_p10 = scmp.ne.s32.totalorder %s820_s10, %s821_s1  ;;  %p826_p0 = scmp.lt.s32.totalorder %s820_s10, %s1103_s6 }
 0x15c   : > { %433 = vst [vmem:[%s312_s28] sm:$0xff] %v430_v58  ;;  %p827_p2 = scmp.lt.s32.totalorder %s825_s20, %s821_s1 }
 0x15d   : > { %p823_p13 = pnand %p822_p10, %p991_p4 }
 0x15e   : > { %p828_p1 = por %p827_p2, %p826_p0 }
 0x15f   : > { %p824_p11 = pneg %p823_p13 }
 0x161   : > { %p829_p3 = pnand %p828_p1, %p824_p11 }
 0x163   : > { %832 = shalt.err (!%p829_p3)
}
 0x164   : > { %621 = dma.vmem_to_hbm [thread:$0]  (%p991_p4), %s467_s29, 128, %s469_s27, %s440_s13  }
 0x165 PF: > { %s480_s30 = sand.u32 1, %s867_s21   ;;  %p1112_p5 = scmp.ge.s32.totalorder %s879_s24, 2 }
 0x166   : > { %s481_s11 = scalar_lea.sflag [#allocation4], %s480_s30 }
 0x167   : > { %p636_p12 = pnand %p1112_p5, %p995_p6 }
 0x169   : > { %p637_p7 = pneg %p636_p12 }
 0x16b   : > { %858 = dma.done.wait (%p637_p7), %s481_s11, 128  }
 0x16c   : > { %860 = vsyncadd (%p637_p7), %s481_s11, 4294967168  ;;  %s491_s12 = scalar_lea.sflag [#allocation10], %s480_s30 }
 0x16d   : > { %862 = dma.done.wait (%p637_p7), %s491_s12, 128  }
 0x16e   : > { %864 = vsyncadd (%p637_p7), %s491_s12, 4294967168  ;;  %p24_p4 = scmp.ge.s32.totalorder %s965_s18, 4   ;;  %s1113_s21 = smov %s871_s22 }
 0x16f   : > { %s1114_s22 = smov %s875_s23  ;;  %s1115_s23 = smov %s976_s25 }
 0x170   : > { %s1116_s24 = smov %s965_s18  ;;  %26 = sbr.rel (!%p24_p4) target bundleno = 10 (0xa), region = 110 }
 0x175   :  { %497 = vsyncpa [#allocation3], 1 }
 0x176   :  { %499 = vsyncpa [#allocation3 + $0x1], 1 }
 0x177   :  { %500 = vsyncpa [#allocation6], 1 }
 0x178   :  { %501 = vsyncpa [#allocation4], 1 }
 0x179   :  { %503 = vsyncpa [#allocation4 + $0x1], 1 }
 0x17a   :  { %504 = vsyncpa [#allocation10], 1 }
 0x17b   :  { %506 = vsyncpa [#allocation10 + $0x1], 1 }

</bundles_post_ra>
